<compile_context>
chip_gen: v7x
topology: tpu7x:2x2x1
jax: 0.10.0
libtpu: 0.0.40
codegen_flags: <defaults>
</compile_context>

<pallas_src>
import functools

import jax
import jax.numpy as jnp
from jax.experimental import pallas as pl
from jax.experimental.pallas import tpu as pltpu


def _round_up(x, m):
    return (x + m - 1) // m * m


def _embedding_kernel(seed_ref, ids_ref, pos_ref, wte_hbm, wpe_hbm, out_ref,
                      wbuf, pbuf, sems, *, vocab, max_seq, dropout_p):
    tn, hidden = out_ref.shape
    base = pl.program_id(0) * tn                    # first token of this block

    # ---- issue one row-gather DMA per token (word + positional) ------------
    # All 2*TN copies are issued before any wait, so they overlap each other.
    def issue(t, carry):
        tok = jnp.clip(ids_ref[base + t], 0, vocab - 1)      # clamp OOB ids
        pos = jnp.clip(pos_ref[base + t], 0, max_seq - 1)
        pltpu.make_async_copy(wte_hbm.at[pl.ds(tok, 1)],
                              wbuf.at[pl.ds(t, 1)], sems.at[0]).start()
        pltpu.make_async_copy(wpe_hbm.at[pl.ds(pos, 1)],
                              pbuf.at[pl.ds(t, 1)], sems.at[1]).start()
        return carry
    jax.lax.fori_loop(0, tn, issue, 0)

    # ---- drain: one wait per issued copy (equal-sized copies share a sem) ---
    def drain(t, carry):
        pltpu.make_async_copy(wte_hbm.at[pl.ds(0, 1)],
                              wbuf.at[pl.ds(t, 1)], sems.at[0]).wait()
        pltpu.make_async_copy(wpe_hbm.at[pl.ds(0, 1)],
                              pbuf.at[pl.ds(t, 1)], sems.at[1]).wait()
        return carry
    jax.lax.fori_loop(0, tn, drain, 0)

    emb = wbuf[...].astype(jnp.float32) + pbuf[...].astype(jnp.float32)

    # ---- embedding dropout (training semantics: keep w.p. 1-p, scale 1/(1-p))
    if dropout_p > 0.0:
        # Stateless counter-based PRNG (murmur3 finalizer), keyed on
        # (seed, global element index): portable to interpret mode and
        # deterministic regardless of how the grid is split across cores.
        seed_u = seed_ref[0].astype(jnp.uint32)
        row = jax.lax.broadcasted_iota(jnp.uint32, (tn, hidden), 0)
        col = jax.lax.broadcasted_iota(jnp.uint32, (tn, hidden), 1)
        ctr = (base.astype(jnp.uint32) + row) * jnp.uint32(hidden) + col
        h = ctr ^ (seed_u * jnp.uint32(0x9E3779B9) + jnp.uint32(0x7F4A7C15))
        h = (h ^ (h >> 16)) * jnp.uint32(0x85EBCA6B)
        h = (h ^ (h >> 13)) * jnp.uint32(0xC2B2AE35)
        h = h ^ (h >> 16)
        thresh = jnp.uint32(min(int(round(dropout_p * 4294967296.0)),
                                4294967295))
        keep = h >= thresh                                   # P(keep) = 1 - p
        emb = jnp.where(keep,
                        emb * jnp.float32(1.0 / (1.0 - dropout_p)),
                        jnp.float32(0.0))

    out_ref[...] = emb.astype(out_ref.dtype)


def embedding_forward(input_ids, position_ids, wte, wpe, *,
                      dropout_p=0.0, seed=0, token_block=256):
    """input_ids, position_ids: (B, S) int.  wte: (V, H).  wpe: (max_seq, H)."""
    B, S = input_ids.shape
    V, H = wte.shape
    MAXS, H2 = wpe.shape
    assert H == H2
    N = B * S

    # choose a lane/sublane-friendly token block and pad N up to a multiple
    TN = min(int(token_block), _round_up(N, 8))
    TN = _round_up(TN, 8)
    Np = _round_up(N, TN)

    ids = input_ids.reshape(N).astype(jnp.int32)
    pos = position_ids.reshape(N).astype(jnp.int32)
    if Np != N:
        pad = Np - N
        ids = jnp.concatenate([ids, jnp.zeros((pad,), jnp.int32)])
        pos = jnp.concatenate([pos, jnp.zeros((pad,), jnp.int32)])
    seed_arr = jnp.array([seed], dtype=jnp.int32)

    kernel = functools.partial(_embedding_kernel, vocab=V, max_seq=MAXS,
                               dropout_p=float(dropout_p))

    out = pl.pallas_call(
        kernel,
        out_shape=jax.ShapeDtypeStruct((Np, H), wte.dtype),
        grid_spec=pltpu.PrefetchScalarGridSpec(
            num_scalar_prefetch=3,                 # seed, ids, pos -> SMEM
            grid=(Np // TN,),
            in_specs=[
                pl.BlockSpec(memory_space=pl.ANY),   # word table stays in HBM
                pl.BlockSpec(memory_space=pl.ANY),   # pos  table stays in HBM
            ],
            out_specs=pl.BlockSpec((TN, H), lambda i, seed, ids, pos: (i, 0)),
            scratch_shapes=[
                pltpu.VMEM((TN, H), wte.dtype),      # gathered word rows
                pltpu.VMEM((TN, H), wpe.dtype),      # gathered pos rows
                pltpu.SemaphoreType.DMA((2,)),       # one sem per table
            ],
        ),
        compiler_params=pltpu.CompilerParams(
            dimension_semantics=("parallel",)),      # blocks are independent
    )(seed_arr, ids, pos, wte, wpe)

    return out[:N].reshape(B, S, H)


if __name__ == "__main__":
    # small shapes consistent with the module
    B, S, H, V, MAXS = 2, 8, 128, 512, 128
    dropout_prob = 0.1

    key = jax.random.PRNGKey(0)
    k1, k2, k3 = jax.random.split(key, 3)

    # deterministic "init_method": normal(0, 0.02), as in megatron defaults
    wte = 0.02 * jax.random.normal(k1, (V, H), dtype=jnp.float32)
    wpe = 0.02 * jax.random.normal(k2, (MAXS, H), dtype=jnp.float32)

    input_ids = jax.random.randint(k3, (B, S), 0, V, dtype=jnp.int32)
    position_ids = jnp.broadcast_to(
        jnp.arange(S, dtype=jnp.int32)[None, :], (B, S))

    ref = wte[input_ids] + wpe[position_ids]

    # eval mode (dropout disabled) -> exact match with the reference gather+add
    out_eval = embedding_forward(input_ids, position_ids, wte, wpe,
                                 dropout_p=0.0)
    out_eval = jax.block_until_ready(out_eval)
    assert out_eval.shape == (B, S, H)
    assert jnp.allclose(out_eval, ref, atol=1e-5, rtol=1e-5), "mismatch vs ref"

    # train mode: every element is either exactly 0 or ref/(1-p)
    out_train = embedding_forward(input_ids, position_ids, wte, wpe,
                                  dropout_p=dropout_prob, seed=1234)
    out_train = jax.block_until_ready(out_train)
    assert out_train.shape == (B, S, H)
    scaled = ref * (1.0 / (1.0 - dropout_prob))
    kept = out_train != 0.0
    assert bool(jnp.any(kept)) and bool(jnp.any(~kept)), "degenerate dropout"
    assert jnp.allclose(jnp.where(kept, out_train, scaled), scaled,
                        atol=1e-5, rtol=1e-5), "kept values not scaled ref"

    print("KERNEL_OK")
</pallas_src>

<mosaic_0001>
module attributes {stable_mosaic.version = 11 : i64} {
  func.func @_embedding_kernel(%arg0: i32, %arg1: memref<1xi32, #tpu.memory_space<smem>>, %arg2: memref<16xi32, #tpu.memory_space<smem>>, %arg3: memref<16xi32, #tpu.memory_space<smem>>, %arg4: memref<512x128xf32, #tpu.memory_space<any>>, %arg5: memref<128x128xf32, #tpu.memory_space<any>>, %arg6: memref<16x128xf32, #tpu.memory_space<vmem>>, %arg7: memref<16x128xf32, #tpu.memory_space<vmem>>, %arg8: memref<16x128xf32, #tpu.memory_space<vmem>>, %arg9: memref<2x!tpu.dma_semaphore, #tpu.memory_space<semaphore_mem>>) attributes {dimension_semantics = [#tpu.dimension_semantics<parallel>], iteration_bounds = array<i64: 1>, scalar_prefetch = 3 : i64, scratch_operands = 3 : i64, tpu.core_type = #tpu.core_type<tc>, window_params = [{}, {}, {transform_indices = @transform_2, window_bounds = array<i64: 16, 128>}]} {
    %c16_i32 = arith.constant 16 : i32
    %0 = arith.muli %arg0, %c16_i32 : i32
    %c0_i32 = arith.constant 0 : i32
    %c16_i32_0 = arith.constant 16 : i32
    %1 = arith.addi %c0_i32, %c16_i32_0 : i32
    %c1_i32 = arith.constant 1 : i32
    scf.for %arg10 = %c0_i32 to %1 step %c1_i32  : i32 {
      %7 = arith.addi %0, %arg10 : i32
      %8 = arith.index_cast %7 : i32 to index
      %9 = memref.load %arg2[%8] : memref<16xi32, #tpu.memory_space<smem>>
      %c0_i32_11 = arith.constant 0 : i32
      %c511_i32 = arith.constant 511 : i32
      %10 = arith.maxsi %c0_i32_11, %9 : i32
      %11 = arith.minsi %c511_i32, %10 : i32
      %12 = arith.addi %0, %arg10 : i32
      %13 = arith.index_cast %12 : i32 to index
      %14 = memref.load %arg3[%13] : memref<16xi32, #tpu.memory_space<smem>>
      %c0_i32_12 = arith.constant 0 : i32
      %c127_i32 = arith.constant 127 : i32
      %15 = arith.maxsi %c0_i32_12, %14 : i32
      %16 = arith.minsi %c127_i32, %15 : i32
      %c0_i32_13 = arith.constant 0 : i32
      %c0_i32_14 = arith.constant 0 : i32
      %17 = tpu.memref_slice %arg4[%11, %c0_i32_14] : memref<512x128xf32, #tpu.memory_space<any>> -> memref<1x128xf32, #tpu.memory_space<any>>
      %c0_i32_15 = arith.constant 0 : i32
      %18 = tpu.memref_slice %arg7[%arg10, %c0_i32_15] : memref<16x128xf32, #tpu.memory_space<vmem>> -> memref<1x128xf32, #tpu.memory_space<vmem>>
      %19 = tpu.memref_slice %arg9[%c0_i32_13] : memref<2x!tpu.dma_semaphore, #tpu.memory_space<semaphore_mem>> -> memref<1x!tpu.dma_semaphore, #tpu.memory_space<semaphore_mem>>
      %20 = tpu.memref_squeeze %19 : memref<1x!tpu.dma_semaphore, #tpu.memory_space<semaphore_mem>> -> memref<!tpu.dma_semaphore, #tpu.memory_space<semaphore_mem>>
      tpu.enqueue_dma source(%17 : memref<1x128xf32, #tpu.memory_space<any>>) target(%18 : memref<1x128xf32, #tpu.memory_space<vmem>>) target_semaphore(%20 : memref<!tpu.dma_semaphore, #tpu.memory_space<semaphore_mem>>)
      %c1_i32_16 = arith.constant 1 : i32
      %c0_i32_17 = arith.constant 0 : i32
      %21 = tpu.memref_slice %arg5[%16, %c0_i32_17] : memref<128x128xf32, #tpu.memory_space<any>> -> memref<1x128xf32, #tpu.memory_space<any>>
      %c0_i32_18 = arith.constant 0 : i32
      %22 = tpu.memref_slice %arg8[%arg10, %c0_i32_18] : memref<16x128xf32, #tpu.memory_space<vmem>> -> memref<1x128xf32, #tpu.memory_space<vmem>>
      %23 = tpu.memref_slice %arg9[%c1_i32_16] : memref<2x!tpu.dma_semaphore, #tpu.memory_space<semaphore_mem>> -> memref<1x!tpu.dma_semaphore, #tpu.memory_space<semaphore_mem>>
      %24 = tpu.memref_squeeze %23 : memref<1x!tpu.dma_semaphore, #tpu.memory_space<semaphore_mem>> -> memref<!tpu.dma_semaphore, #tpu.memory_space<semaphore_mem>>
      tpu.enqueue_dma source(%21 : memref<1x128xf32, #tpu.memory_space<any>>) target(%22 : memref<1x128xf32, #tpu.memory_space<vmem>>) target_semaphore(%24 : memref<!tpu.dma_semaphore, #tpu.memory_space<semaphore_mem>>)
    }
    %c16_i32_1 = arith.constant 16 : i32
    %c0_i32_2 = arith.constant 0 : i32
    %c16_i32_3 = arith.constant 16 : i32
    %2 = arith.addi %c0_i32_2, %c16_i32_3 : i32
    %c1_i32_4 = arith.constant 1 : i32
    scf.for %arg10 = %c0_i32_2 to %2 step %c1_i32_4  : i32 {
      %c0_i32_11 = arith.constant 0 : i32
      %c0_i32_12 = arith.constant 0 : i32
      %c0_i32_13 = arith.constant 0 : i32
      %7 = tpu.memref_slice %arg4[%c0_i32_12, %c0_i32_13] : memref<512x128xf32, #tpu.memory_space<any>> -> memref<1x128xf32, #tpu.memory_space<any>>
      %c0_i32_14 = arith.constant 0 : i32
      %8 = tpu.memref_slice %arg7[%arg10, %c0_i32_14] : memref<16x128xf32, #tpu.memory_space<vmem>> -> memref<1x128xf32, #tpu.memory_space<vmem>>
      %9 = tpu.memref_slice %arg9[%c0_i32_11] : memref<2x!tpu.dma_semaphore, #tpu.memory_space<semaphore_mem>> -> memref<1x!tpu.dma_semaphore, #tpu.memory_space<semaphore_mem>>
      %10 = tpu.memref_squeeze %9 : memref<1x!tpu.dma_semaphore, #tpu.memory_space<semaphore_mem>> -> memref<!tpu.dma_semaphore, #tpu.memory_space<semaphore_mem>>
      tpu.wait_dma2 semaphore(%10 : memref<!tpu.dma_semaphore, #tpu.memory_space<semaphore_mem>>) src(%7 : memref<1x128xf32, #tpu.memory_space<any>>) dst(%8 : memref<1x128xf32, #tpu.memory_space<vmem>>)
      %c1_i32_15 = arith.constant 1 : i32
      %c0_i32_16 = arith.constant 0 : i32
      %c0_i32_17 = arith.constant 0 : i32
      %11 = tpu.memref_slice %arg5[%c0_i32_16, %c0_i32_17] : memref<128x128xf32, #tpu.memory_space<any>> -> memref<1x128xf32, #tpu.memory_space<any>>
      %c0_i32_18 = arith.constant 0 : i32
      %12 = tpu.memref_slice %arg8[%arg10, %c0_i32_18] : memref<16x128xf32, #tpu.memory_space<vmem>> -> memref<1x128xf32, #tpu.memory_space<vmem>>
      %13 = tpu.memref_slice %arg9[%c1_i32_15] : memref<2x!tpu.dma_semaphore, #tpu.memory_space<semaphore_mem>> -> memref<1x!tpu.dma_semaphore, #tpu.memory_space<semaphore_mem>>
      %14 = tpu.memref_squeeze %13 : memref<1x!tpu.dma_semaphore, #tpu.memory_space<semaphore_mem>> -> memref<!tpu.dma_semaphore, #tpu.memory_space<semaphore_mem>>
      tpu.wait_dma2 semaphore(%14 : memref<!tpu.dma_semaphore, #tpu.memory_space<semaphore_mem>>) src(%11 : memref<1x128xf32, #tpu.memory_space<any>>) dst(%12 : memref<1x128xf32, #tpu.memory_space<vmem>>)
    }
    %c16_i32_5 = arith.constant 16 : i32
    %c0 = arith.constant 0 : index
    %c0_6 = arith.constant 0 : index
    %3 = vector.load %arg7[%c0, %c0_6] : memref<16x128xf32, #tpu.memory_space<vmem>>, vector<16x128xf32>
    %c0_7 = arith.constant 0 : index
    %c0_8 = arith.constant 0 : index
    %4 = vector.load %arg8[%c0_7, %c0_8] : memref<16x128xf32, #tpu.memory_space<vmem>>, vector<16x128xf32>
    %5 = arith.addf %3, %4 : vector<16x128xf32>
    %c0_9 = arith.constant 0 : index
    %c0_10 = arith.constant 0 : index
    %6 = vector.load %arg6[%c0_9, %c0_10] : memref<16x128xf32, #tpu.memory_space<vmem>>, vector<16x128xf32>
    tpu.vector_store %arg6[%c0_9, %c0_10], %5 {strides = array<i32>} : memref<16x128xf32, #tpu.memory_space<vmem>>, vector<16x128xf32>,
    return
  }
  func.func @transform_2(%arg0: i32, %arg1: memref<1xi32, #tpu.memory_space<smem>>, %arg2: memref<16xi32, #tpu.memory_space<smem>>, %arg3: memref<16xi32, #tpu.memory_space<smem>>) -> (i32, i32) {
    %c0_i32 = arith.constant 0 : i32
    %c0_i32_0 = arith.constant 0 : i32
    return %arg0, %c0_i32 : i32, i32
  }
}

</mosaic_0001>

<bundles_post_ra>
// kernel: tpu_custom_call.1
= control target key start
LH: loop header
LB: loop body
LE: loop exit
PB: predicated region body
PF: predicated region fallthrough
CT: control target
= control target key end

     0   :  { %s388_s0 = inlined_call_operand.<no memory space> [shape: s32[1], index: 0, kind: input, shape index: {}]   ;;  %s389_s1 = inlined_call_operand.vmem [shape: s32[16], index: 1, kind: input, shape index: {}]   ;;  %s390_s3 = inlined_call_operand.hbm [shape: f32[512,128], index: 3, kind: input, shape index: {}]   ;;  %s391_s4 = inlined_call_operand.hbm [shape: f32[128,128], index: 4, kind: input, shape index: {}]   ;;  %s392_s5 = inlined_call_operand.hbm [shape: f32[16,128], index: 5, kind: output, shape index: {}]   ;;  %s393_s2 = inlined_call_operand.vmem [shape: s32[16], index: 2, kind: input, shape index: {}]  }
   0x1   :  { %s11_s20 = sshll.u32 %s389_s1, 4  ;;  %s15_s22 = sshll.u32 %s393_s2, 4  ;;  %s12_s20 = int_to_ptr.vmem [resolvable:$true] %s11_s20  ;;  %s16_s22 = int_to_ptr.vmem [resolvable:$true] %s15_s22 }
   0x2   :  { %s173_s23 = scalar_lea.vmem %s12_s20, 16  ;;  %p178_p1 = scmp.lt.s32.totalorder %s12_s20, %s12_s20 }
   0x3   :  { %p174_p0 = scmp.ne.s32.totalorder %s12_s20, %s173_s23  ;;  %p179_p2 = scmp.lt.s32.totalorder %s173_s23, %s173_s23 }
   0x5   :  { %p180_p3 = por %p179_p2, %p178_p1 }
   0x7   :  { %p181_p4 = pnand %p180_p3, %p174_p0 }
   0x9   :  { %184 = shalt.err (!%p181_p4)  }
   0xa   :  { %s291_s24 = smov [#allocation7]   ;;  %s185_s25 = scalar_lea.vmem %s16_s22, 16 }
   0xb   :  { %14 = dma.vmem_to_smem %s12_s20, 16, %s291_s24, [#allocation5] }
   0xc   :  { %p186_p5 = scmp.ne.s32.totalorder %s16_s22, %s185_s25  ;;  %p190_p6 = scmp.lt.s32.totalorder %s16_s22, %s16_s22 }
   0xd   :  { %p191_p7 = scmp.lt.s32.totalorder %s185_s25, %s185_s25 }
   0xf   :  { %p192_p8 = por %p191_p7, %p190_p6 }
  0x11   :  { %p193_p9 = pnand %p192_p8, %p186_p5 }
  0x13   :  { %196 = shalt.err (!%p193_p9)  }
  0x14   :  { %s292_s1 = smov [#allocation8]  }
  0x15   :  { %18 = dma.vmem_to_smem %s16_s22, 16, %s292_s1, [#allocation5] }
  0x16   :  { %275 = dma.done.wait [#allocation5], 32 }
  0x17   :  { %276 = vsyncadd [#allocation5], 4294967264 }
  0x18   :  { %20 = sfence }
  0x19   :  { %21 = vsyncpa [#allocation10], 0  ;;  %s334_s2 = smov 0  }
  0x1a LB: > { %s30_s26 = sld [smem:[#allocation7 + %s285_s2]]  ;;  %s42_s28 = scalar_lea.vmem [#allocation2], %s285_s2  ;;  %s285_s2 = sphi %s334_s2, %s28_s2  }
  0x1b   : > { %s35_s27 = sld [smem:[#allocation8 + %s285_s2]]  ;;  %s50_s29 = sshll.u32 %s42_s28, 4  ;;  %s342_s29 = int_to_ptr.vmem [resolvable:$true] %s50_s29 }
  0x1c   : > { %s56_s30 = scalar_lea.vmem [#allocation3], %s285_s2  ;;  %s199_s15 = scalar_lea.hbm %s390_s3, 8192 }
  0x1d   : > { %s65_s6 = sshll.u32 %s56_s30, 4  ;;  %s345_s6 = int_to_ptr.vmem [resolvable:$true] %s65_s6 }
  0x20   : > { %p31_p10 = scmp.gt.s32.totalorder %s30_s26, 0  ;;  %p134_p11 = scmp.lt.s32.totalorder %s30_s26, 511 }
  0x21   : > { %p36_p12 = scmp.gt.s32.totalorder %s35_s27, 0  ;;  %p139_p13 = scmp.lt.s32.totalorder %s35_s27, 127 }
  0x22   : > { %s395_s26 = smov (!%p31_p10, %s30_s26), 0 }
  0x23   : > { %s397_s27 = smov (!%p36_p12, %s35_s27), 0  ;;  %s399_s26 = smov (!%p134_p11, %s395_s26), 511 }
  0x24   : > { %s401_s27 = smov (!%p139_p13, %s397_s27), 127  ;;  %s144_s7 = sshll.u32 %s399_s26, 4 }
  0x25   : > { %s41_s10 = scalar_lea.hbm %s390_s3, %s144_s7  ;;  %s145_s11 = sshll.u32 %s401_s27, 4 }
  0x26   : > { %s197_s12 = scalar_lea.hbm %s41_s10, 16  ;;  %p200_p1 = scmp.lt.u32.totalorder %s41_s10, %s390_s3 }
  0x27   : > { %p198_p0 = scmp.ne.s32.totalorder %s41_s10, %s197_s12  ;;  %p201_p2 = scmp.lt.u32.totalorder %s199_s15, %s197_s12 }
  0x28   : > { %p203_p4 = scmp.lt.u32.totalorder %s197_s12, %s41_s10 }
  0x29   : > { %p202_p3 = por %p201_p2, %p200_p1 }
  0x2b   : > { %p204_p5 = por %p203_p4, %p202_p3 }
  0x2d   : > { %p205_p6 = pnand %p204_p5, %p198_p0 }
  0x2f   : > { %208 = shalt.err (!%p205_p6)  }
  0x30   : > { %s209_s18 = scalar_lea.vmem %s342_s29, 16  ;;  %s293_s19 = smov [#allocation2]  }
  0x31   : > { %p210_p7 = scmp.ne.s32.totalorder %s342_s29, %s209_s18  ;;  %s211_s20 = sshll.u32 %s293_s19, 4  ;;  %s212_s20 = int_to_ptr.vmem [resolvable:$false] %s211_s20 }
  0x32   : > { %s213_s0 = scalar_lea.vmem %s212_s20, 256  ;;  %p214_p8 = scmp.lt.s32.totalorder %s342_s29, %s212_s20 }
  0x33   : > { %p215_p9 = scmp.lt.s32.totalorder %s213_s0, %s209_s18 }
  0x35   : > { %p216_p10 = por %p215_p9, %p214_p8 }
  0x37   : > { %p217_p11 = pnand %p216_p10, %p210_p7 }
  0x39   : > { %220 = shalt.err (!%p217_p11)  }
  0x3a   : > { %53 = dma.hbm_to_vmem [thread:$0]  %s41_s10, 16, %s342_s29, [#allocation4] }
  0x3b   : > { %s55_s23 = scalar_lea.hbm %s391_s4, %s145_s11  ;;  %s223_s26 = scalar_lea.hbm %s391_s4, 2048 }
  0x3c   : > { %s221_s24 = scalar_lea.hbm %s55_s23, 16  ;;  %p224_p13 = scmp.lt.u32.totalorder %s55_s23, %s391_s4 }
  0x3d   : > { %p222_p12 = scmp.ne.s32.totalorder %s55_s23, %s221_s24  ;;  %p225_p0 = scmp.lt.u32.totalorder %s223_s26, %s221_s24 }
  0x3e   : > { %p227_p2 = scmp.lt.u32.totalorder %s221_s24, %s55_s23 }
  0x3f   : > { %p226_p1 = por %p225_p0, %p224_p13 }
  0x41   : > { %p228_p3 = por %p227_p2, %p226_p1 }
  0x43   : > { %p229_p4 = pnand %p228_p3, %p222_p12 }
  0x45   : > { %232 = shalt.err (!%p229_p4)  }
  0x46   : > { %s233_s29 = scalar_lea.vmem %s345_s6, 16  ;;  %s294_s30 = smov [#allocation3]  }
  0x47   : > { %p234_p5 = scmp.ne.s32.totalorder %s345_s6, %s233_s29  ;;  %s235_s7 = sshll.u32 %s294_s30, 4  ;;  %s236_s7 = int_to_ptr.vmem [resolvable:$false] %s235_s7 }
  0x48   : > { %s237_s8 = scalar_lea.vmem %s236_s7, 256  ;;  %p238_p6 = scmp.lt.s32.totalorder %s345_s6, %s236_s7 }
  0x49   : > { %p239_p7 = scmp.lt.s32.totalorder %s237_s8, %s233_s29 }
  0x4b   : > { %p240_p8 = por %p239_p7, %p238_p6 }
  0x4d   : > { %p241_p9 = pnand %p240_p8, %p234_p5 }
  0x4f   : > { %244 = shalt.err (!%p241_p9)  }
  0x50   : > { %68 = dma.hbm_to_vmem [thread:$0]  %s55_s23, 16, %s345_s6, [#allocation4 + $0x1] }
  0x51   : > { %s28_s2 = sadd.s32 1, %s285_s2  }
  0x52   : > { %p25_p10 = scmp.ge.s32.totalorder %s28_s2, 16  }
  0x53   :  { %s287_s9 = smov (%p25_p10), 0  }
  0x54   :  { %27 = sbr.rel (!%p25_p10) target bundleno = 26 (0x1a), region = 49 }
  0x5b LB: > { %277 = dma.done.wait [#allocation4], 16  ;;  %s289_s9 = sphi %s287_s9, %s74_s9  }
  0x5c   : > { %278 = vsyncadd [#allocation4], 4294967280 }
  0x5d   : > { %279 = dma.done.wait [#allocation4 + $0x1], 16 }
  0x5e   : > { %280 = vsyncadd [#allocation4 + $0x1], 4294967280  ;;  %s74_s9 = sadd.s32 1, %s289_s9  }
  0x5f   : > { %p71_p11 = scmp.ge.s32.totalorder %s74_s9, 16  }
  0x60   :  { %v81_v0 = vld [vmem:[#allocation2] sm:$0xff] (%p71_p11)  ;;  %v83_v1 = vld [vmem:[#allocation3] sm:$0xff] (%p71_p11)  ;;  %v82_v2 = vld [vmem:[#allocation2 + $0x8] sm:$0xff] (%p71_p11)  ;;  %s295_s6 = smov (%p71_p11), [#allocation9]  }
  0x61   :  { %73 = sbr.rel (!%p71_p11) target bundleno = 91 (0x5b), region = 60  ;;  %v85_v3 = vadd.f32 (%p71_p11), %v83_v1, %v81_v0  ;;  %v84_v4 = vld [vmem:[#allocation3 + $0x8] sm:$0xff] (%p71_p11)  ;;  %s94_s2 = sshll.u32 (%p71_p11), %s295_s6, 4  ;;  %s95_s2 = int_to_ptr.vmem [resolvable:$true] %s94_s2 }
  0x62   :  { %v86_v5 = vadd.f32 (%p71_p11), %v84_v4, %v82_v2  ;;  %s245_s3 = scalar_lea.vmem (%p71_p11), %s95_s2, 256  ;;  %p250_p13 = scmp.lt.s32.totalorder (%p71_p11), %s95_s2, %s95_s2 }
  0x63   :  { %87 = vst [vmem:[#allocation9] sm:$0xff] (%p71_p11), %v85_v3  ;;  %p246_p12 = scmp.ne.s32.totalorder (%p71_p11), %s95_s2, %s245_s3  ;;  %p251_p0 = scmp.lt.s32.totalorder (%p71_p11), %s245_s3, %s245_s3 }
  0x64   :  { %88 = vst [vmem:[#allocation9 + $0x8] sm:$0xff] (%p71_p11), %v86_v5 }
  0x65   :  { %p252_p1 = por (%p71_p11), %p251_p0, %p250_p13 }
  0x67   :  { %p253_p2 = pnand (%p71_p11), %p252_p1, %p246_p12 }
  0x69   :  { %256 = shalt.err (!%p253_p2)
}
  0x6a   :  { %s257_s11 = scalar_lea.hbm %s392_s5, 256 }
  0x6b   :  { %p258_p3 = scmp.ne.s32.totalorder %s392_s5, %s257_s11  ;;  %p261_p4 = scmp.lt.u32.totalorder %s257_s11, %s392_s5 }
  0x6d   :  { %p263_p5 = pnand %p261_p4, %p258_p3 }
  0x6f   :  { %266 = shalt.err (!%p263_p5)
}
  0x70   :  { %s296_s16 = smov 128   ;;  %s297_s17 = smov 8  }
  0x71   :  { %100 = dma.vmem_to_hbm [thread:$0]  %s95_s2, 256, %s392_s5, [#allocation10], %s296_s16, %s296_s16, %s297_s17  }
  0x72   :  { %281 = dma.done.wait [#allocation10], 256  }
  0x73   :  { %282 = vsyncadd [#allocation10], 4294967040 }
  0x74   :  { %104 = vsyncpa [#allocation10], 1 }
  0x75   :  { %105 = vsyncmov [#allocation4] }
  0x78   :  { %s106_s20 = vpop.sfrf %105 }
  0x79   :  { %p146_p6 = scmp.ne.s32.totalorder %s106_s20, 0 }
  0x7b   :  { %110 = shalt.err (%p146_p6)  }
  0x7c   :  { %112 = vsyncmov [#allocation4 + $0x1] }
  0x7f   :  { %s113_s0 = vpop.sfrf %112 }
  0x80   :  { %p147_p7 = scmp.ne.s32.totalorder %s113_s0, 0 }
  0x82   :  { %117 = shalt.err (%p147_p7)  }

</bundles_post_ra>
